<compile_context>
chip_gen: v5e
topology: v5e:2x2
jax: 0.10.0
libtpu: 0.0.40
codegen_flags: <defaults>
</compile_context>

<pallas_src>
import functools

import numpy as np
import jax
import jax.numpy as jnp
from jax.experimental import pallas as pl
from jax.experimental.pallas import tpu as pltpu

LANES = 128
_TARGET_BLOCK_BYTES = 4 * 1024 * 1024   # ~4 MiB blocks (fallback copy path)
_VMEM_LIMIT_BYTES = 40 * 1024 * 1024    # room for 4 double-buffered 4 MiB blocks
                                        # on v5e / v6e / v7x


# ----------------------------------------------------------------------------
# Primary path: metadata-only view.  Empty kernel body; output aliases input.
# ----------------------------------------------------------------------------
def _noop_view_kernel(x_ref, o_ref):
    # Output aliases input and a view is metadata-only: nothing to do.
    del x_ref, o_ref


@functools.partial(jax.jit, static_argnums=1, donate_argnums=0)
def _aliased_noop_view(x, out_size):
    out = pl.pallas_call(
        _noop_view_kernel,
        out_shape=jax.ShapeDtypeStruct(x.shape, x.dtype),
        in_specs=[pl.BlockSpec(memory_space=pl.ANY)],   # raw HBM ref, no auto-DMA
        out_specs=pl.BlockSpec(memory_space=pl.ANY),
        input_output_aliases={0: 0},
    )(x)
    return jnp.reshape(out, out_size)                   # metadata-only reshape


# ----------------------------------------------------------------------------
# Fallback path: tiled streaming identity copy (only used if the no-op
# ANY-space kernel is rejected by the active backend / interpreter).
# ----------------------------------------------------------------------------
def _copy_kernel(x_ref, o_ref):
    o_ref[...] = x_ref[...]


@functools.partial(jax.jit, static_argnums=1)
def _tiled_copy_view(x, out_size):
    total = int(np.prod(x.shape))
    dtype = x.dtype
    itemsize = int(np.dtype(dtype).itemsize)
    x_flat = jnp.ravel(x)  # metadata-only for a contiguous row-major input

    if total % LANES == 0:
        rows = total // LANES
        x2d = x_flat.reshape(rows, LANES)

        packing = max(1, 4 // itemsize)   # sublane packing: 8/16/32 rows per vreg
        native = 8 * packing

        if rows <= native:
            block_rows = rows             # tiny tensor: one full-dims block
            grid = (1,)
        else:
            # >= 2 grid steps (v7x dual-TC sharding + DMA/compute overlap),
            # capped at ~4 MiB per block, rounded to the native packing.
            cap = max(native, (rows // 2) // native * native)
            tgt = max(native,
                      (_TARGET_BLOCK_BYTES // (LANES * itemsize)) // native * native)
            block_rows = min(cap, tgt)
            grid = (pl.cdiv(rows, block_rows),)

        out2d = pl.pallas_call(
            _copy_kernel,
            out_shape=jax.ShapeDtypeStruct((rows, LANES), dtype),
            grid=grid,
            in_specs=[pl.BlockSpec((block_rows, LANES), lambda i: (i, 0))],
            out_specs=pl.BlockSpec((block_rows, LANES), lambda i: (i, 0)),
            compiler_params=pltpu.CompilerParams(
                dimension_semantics=("parallel",),
                vmem_limit_bytes=_VMEM_LIMIT_BYTES,
            ),
        )(x2d)
        out_flat = out2d.reshape(-1)
    else:
        # Flat length not a multiple of 128: pick the factorization with the
        # most sublanes (largest divisor <= 512) so the single full-dims block
        # is not sublane-padded 8x like a (1, total) block would be.
        r = 1
        for cand in range(min(total, 512), 0, -1):
            if total % cand == 0:
                r = cand
                break
        cols = total // r
        x2d = x_flat.reshape(r, cols)
        # TODO(synk): tile + mask very large non-128-divisible inputs instead of
        # copying them as a single full-array block.
        out2d = pl.pallas_call(
            _copy_kernel,
            out_shape=jax.ShapeDtypeStruct((r, cols), dtype),
            grid=(1,),
            in_specs=[pl.BlockSpec((r, cols), lambda i: (0, 0))],
            out_specs=pl.BlockSpec((r, cols), lambda i: (0, 0)),
            compiler_params=pltpu.CompilerParams(
                dimension_semantics=("arbitrary",),
                vmem_limit_bytes=_VMEM_LIMIT_BYTES,
            ),
        )(x2d)
        out_flat = out2d.reshape(-1)

    return out_flat.reshape(out_size)


# ----------------------------------------------------------------------------
# Public wrapper == View(size).forward(x)
# ----------------------------------------------------------------------------
def _resolve_size(size, total):
    """Resolve a single -1 in `size` exactly like torch.Tensor.view does."""
    size = tuple(int(s) for s in size)
    neg = [i for i, s in enumerate(size) if s == -1]
    if len(neg) > 1:
        raise ValueError("only one dimension may be -1 in a view size")
    if neg:
        known = 1
        for s in size:
            if s != -1:
                known *= s
        if known == 0 or total % known != 0:
            raise ValueError(f"cannot view {total} elements as {size}")
        size = tuple(total // known if s == -1 else s for s in size)
    if int(np.prod(size)) != total:
        raise ValueError(f"view size {size} incompatible with {total} elements")
    return size


def pallas_view(x, size):
    """Equivalent of View(size).forward(x) == x.view(size).

    NOTE: `x` is donated on the primary (zero-copy, aliased) path.
    """
    out_size = _resolve_size(size, int(np.prod(x.shape)))
    try:
        return _aliased_noop_view(x, out_size)
    except Exception:
        # Extremely defensive: if the ANY-space aliased no-op kernel is
        # rejected by the active backend, fall back to a tiled identity copy.
        return _tiled_copy_view(x, out_size)


if __name__ == "__main__":
    key = jax.random.PRNGKey(0)
    # Shapes consistent with View's use in the Disentanglement model:
    # flatten conv features (B, C, H, W) -> (B, C*H*W) before a linear layer.
    x = jax.random.normal(key, (2, 4, 16, 16), dtype=jnp.float32)
    x_np = np.asarray(x)  # host copy: x is donated to the zero-copy view path
    size = (2, -1)

    out = pallas_view(x, size)
    out = jax.block_until_ready(out)

    ref = x_np.reshape(2, -1)
    assert out.shape == ref.shape, (out.shape, ref.shape)
    assert out.dtype == ref.dtype, (out.dtype, ref.dtype)
    np.testing.assert_array_equal(np.asarray(out), ref)

    # Also exercise the tiled streaming-copy fallback kernel explicitly
    # (fresh, non-donated input).
    x2 = jnp.asarray(x_np)
    out2 = jax.block_until_ready(_tiled_copy_view(x2, ref.shape))
    np.testing.assert_array_equal(np.asarray(out2), ref)

    print("KERNEL_OK")
</pallas_src>

<mosaic_0001>
module attributes {stable_mosaic.version = 11 : i64} {
  func.func @_noop_view_kernel(%arg0: memref<2x4x16x16xf32, #tpu.memory_space<any>>, %arg1: memref<2x4x16x16xf32, #tpu.memory_space<any>>) attributes {dimension_semantics = [], scalar_prefetch = 0 : i64, scratch_operands = 0 : i64, tpu.core_type = #tpu.core_type<tc>} {
    return
  }
}

module attributes {stable_mosaic.version = 11 : i64} {
  func.func @_copy_kernel(%arg0: i32, %arg1: memref<8x128xf32, #tpu.memory_space<vmem>>, %arg2: memref<8x128xf32, #tpu.memory_space<vmem>>) attributes {dimension_semantics = [#tpu.dimension_semantics<parallel>], iteration_bounds = array<i64: 2>, scalar_prefetch = 0 : i64, scratch_operands = 0 : i64, tpu.core_type = #tpu.core_type<tc>, window_params = [{transform_indices = @transform_0, window_bounds = array<i64: 8, 128>}, {transform_indices = @transform_1, window_bounds = array<i64: 8, 128>}]} {
    %c0 = arith.constant 0 : index
    %c0_0 = arith.constant 0 : index
    %0 = vector.load %arg1[%c0, %c0_0] : memref<8x128xf32, #tpu.memory_space<vmem>>, vector<8x128xf32>
    %c0_1 = arith.constant 0 : index
    %c0_2 = arith.constant 0 : index
    %1 = vector.load %arg2[%c0_1, %c0_2] : memref<8x128xf32, #tpu.memory_space<vmem>>, vector<8x128xf32>
    tpu.vector_store %arg2[%c0_1, %c0_2], %0 {strides = array<i32>} : memref<8x128xf32, #tpu.memory_space<vmem>>, vector<8x128xf32>,
    return
  }
  func.func @transform_0(%arg0: i32) -> (i32, i32) {
    %c0_i32 = arith.constant 0 : i32
    %c0_i32_0 = arith.constant 0 : i32
    return %arg0, %c0_i32 : i32, i32
  }
  func.func @transform_1(%arg0: i32) -> (i32, i32) {
    %c0_i32 = arith.constant 0 : i32
    %c0_i32_0 = arith.constant 0 : i32
    return %arg0, %c0_i32 : i32, i32
  }
}

</mosaic_0001>

<bundles_post_ra>
// kernel: _aliased_noop_view.1
= control target key start
LH: loop header
LB: loop body
LE: loop exit
PB: predicated region body
PF: predicated region fallthrough
CT: control target
= control target key end

     0   :  { %s16_s0 = inlined_call_operand.vmem [shape: f32[2,4,16,16], index: 0, kind: input, shape index: {}, may-alias: {0,1}]   ;;  %s17_s1 = inlined_call_operand.vmem [shape: f32[2,4,16,16], index: 1, kind: output, shape index: {}, may-alias: {0,1}]  }

// kernel: _tiled_copy_view.1
= control target key start
LH: loop header
LB: loop body
LE: loop exit
PB: predicated region body
PF: predicated region fallthrough
CT: control target
= control target key end

     0   :  { %s188_s6 = smov 0   ;;  %s208_s0 = inlined_call_operand.vmem [shape: f32[16,128], index: 0, kind: input, shape index: {}]   ;;  %s209_s1 = inlined_call_operand.vmem [shape: f32[16,128], index: 1, kind: output, shape index: {}]  }
   0x1 LB: > { %s167_s7 = sadd.s32 4294967295, %s190_s6   ;;  %p171_p0 = scmp.ge.s32.totalorder %s190_s6, 1  ;;  %s190_s6 = sphi %s188_s6, %s11_s6  }
   0x2   : > { %p86_p1 = scmp.lt.s32.totalorder %s190_s6, 3 }
   0x4   : > { %p87_p2 = pnand %p171_p0, %p86_p1 }
   0x5   : > { %p104_p3 = scmp.lt.s32.totalorder (!%p87_p2), %s167_s7, 1 }
   0x6   : > { %90 = sbr.rel (%p87_p2) target bundleno = 16 (0x10), region = 24 }
   0xb   : > { %s211_s7 = smov (!%p104_p3, %s167_s7), 1 }
   0xc   : > { %s172_s8 = sshll.u32 %s211_s7, 3 }
   0xd   : > { %s107_s11 = scalar_lea.vmem %s208_s0, %s172_s8  ;;  %s111_s14 = scalar_lea.vmem %s209_s1, %s172_s8 }
   0xe   : > { %v112_v0 = vld [vmem:[%s107_s11] sm:$0xff] }
   0xf   : > { %113 = vst [vmem:[%s111_s14] sm:$0xff] %v112_v0 }
  0x10 PF: > { %s11_s6 = sadd.s32 1, %s190_s6  }
  0x11   : > { %p8_p4 = scmp.ge.s32.totalorder %s11_s6, 4  }
  0x13   :  { %10 = sbr.rel (!%p8_p4) target bundleno = 1 (0x1), region = 54 }

</bundles_post_ra>
